<compile_context>
chip_gen: v7x
topology: tpu7x:2x2x1
jax: 0.10.0
libtpu: 0.0.40
codegen_flags: <defaults>
</compile_context>

<pallas_src>
import functools

import jax
import jax.numpy as jnp
from jax.experimental import pallas as pl
from jax.experimental.pallas import tpu as pltpu

LANE = 128
SUBLANE = 8


def _round_up(a, m):
    return ((a + m - 1) // m) * m


def _sublane_multiple(*dtypes):
    """Minimal sublane multiple for the given input dtypes (8 for f32,
    16 for bf16/f16, 32 for 8-bit)."""
    m = SUBLANE
    for d in dtypes:
        itemsize = max(1, jnp.dtype(d).itemsize)
        m = max(m, SUBLANE * (4 // itemsize))
    return m


def _focal_math(x, t, alpha, gamma):
    """Per-element focal loss (float32 in/out). Matches torchvision
    sigmoid_focal_loss."""
    # Numerically-stable BCE-with-logits; e = exp(-|x|) is reused for the
    # sigmoid so the whole element costs 3 EUP ops (exp, log1p, divide).
    e = jnp.exp(-jnp.abs(x))
    ce = jnp.maximum(x, 0.0) - x * t + jnp.log1p(e)

    inv = 1.0 / (1.0 + e)                      # 1 / (1 + exp(-|x|))
    p = jnp.where(x >= 0.0, inv, e * inv)      # sigmoid(x), stable both signs
    p_t = p * t + (1.0 - p) * (1.0 - t)
    one_m_pt = 1.0 - p_t
    if gamma == 2.0:
        focal = one_m_pt * one_m_pt            # VPU-only fast path
    elif gamma == 1.0:
        focal = one_m_pt
    elif gamma == 0.0:
        focal = jnp.ones_like(one_m_pt)
    else:
        focal = one_m_pt ** gamma              # generic gamma (EUP pow)
    loss = ce * focal
    if alpha >= 0:
        alpha_t = alpha * t + (1.0 - alpha) * (1.0 - t)
        loss = alpha_t * loss
    return loss


def _focal_reduce_kernel(x_ref, t_ref, o_ref, *, alpha, gamma, n_valid,
                         block_rows, blocks_per_split, n_full_blocks,
                         needs_mask):
    i = pl.program_id(1)

    @pl.when(i == 0)
    def _():
        o_ref[...] = jnp.zeros_like(o_ref)

    x = x_ref[...].astype(jnp.float32)
    t = t_ref[...].astype(jnp.float32)
    loss = _focal_math(x, t, alpha, gamma)

    def _psum(v):
        # (block_rows, 128) -> (1, 8, 128): vreg-wise VALU adds only; the
        # single cross-lane reduce happens once outside the kernel.
        return v.reshape(block_rows // SUBLANE, SUBLANE, LANE).sum(
            axis=0, keepdims=True)

    if needs_mask:
        gb = pl.program_id(0) * blocks_per_split + i   # global block index

        @pl.when(gb < n_full_blocks)          # fully-valid interior: no mask
        def _():
            o_ref[...] += _psum(loss)

        @pl.when(gb >= n_full_blocks)         # boundary / over-covered blocks
        def _():
            # int32 arithmetic is fine for tensors < 2**31 elements.
            remaining = jnp.int32(n_valid) - gb * jnp.int32(block_rows * LANE)
            r = jax.lax.broadcasted_iota(jnp.int32, loss.shape, 0)
            c = jax.lax.broadcasted_iota(jnp.int32, loss.shape, 1)
            masked = jnp.where(r * LANE + c < remaining, loss, 0.0)
            o_ref[...] += _psum(masked)
    else:
        o_ref[...] += _psum(loss)


def _focal_elementwise_kernel(x_ref, t_ref, o_ref, *, alpha, gamma):
    x = x_ref[...].astype(jnp.float32)
    t = t_ref[...].astype(jnp.float32)
    o_ref[...] = _focal_math(x, t, alpha, gamma).astype(o_ref.dtype)


def _prepare(logits, targets, block_rows):
    """Flatten to a lane-dense (rows, 128) layout; pad only when needed."""
    n = int(logits.size)
    xf = logits.reshape(-1)
    tf = targets.reshape(-1)

    sub = _sublane_multiple(logits.dtype, targets.dtype)
    rows = pl.cdiv(n, LANE)

    # Tile sizing: multiple of the dtype sublane unit, <= array rows, capped
    # so that 2 inputs x 2 pipeline buffers fit every generation's default
    # scoped VMEM (v5e 16 MiB, v6e/v7x 32 MiB) with plenty of headroom.
    block_rows = max(sub, min(int(block_rows), 4096))
    block_rows = _round_up(block_rows, sub)
    if rows >= sub:
        block_rows = min(block_rows, (rows // sub) * sub)
    else:
        block_rows = sub

    rows_arr = rows
    if n % LANE != 0 or rows < sub:
        # Fallback copy only when the flat size is not lane-divisible (or the
        # tensor is tiny); the common divisible case is a zero-copy reshape.
        rows_arr = max(rows, sub)
        pad = rows_arr * LANE - n
        xf = jnp.pad(xf, (0, pad))
        tf = jnp.pad(tf, (0, pad))

    return xf.reshape(rows_arr, LANE), tf.reshape(rows_arr, LANE), n, rows_arr, block_rows


def bf_with_logits_loss(logits, targets, *, alpha=0.25, gamma=2.0,
                        reduction="mean", block_rows=2048, num_splits=2):
    """JAX/Pallas equivalent of BFWithLogitsLoss.forward
    ('mean' | 'sum' | 'none')."""
    assert logits.shape == targets.shape
    if reduction not in ("mean", "sum", "none"):
        raise ValueError(f"unknown reduction: {reduction!r}")

    x2, t2, n, rows_arr, block_rows = _prepare(logits, targets, block_rows)

    if reduction == "none":
        kernel = functools.partial(_focal_elementwise_kernel,
                                   alpha=float(alpha), gamma=float(gamma))
        total_blocks = pl.cdiv(rows_arr, block_rows)
        out = pl.pallas_call(
            kernel,
            out_shape=jax.ShapeDtypeStruct((rows_arr, LANE), jnp.float32),
            grid_spec=pltpu.PrefetchScalarGridSpec(
                num_scalar_prefetch=0,
                grid=(total_blocks,),
                in_specs=[
                    pl.BlockSpec((block_rows, LANE), lambda i: (i, 0)),
                    pl.BlockSpec((block_rows, LANE), lambda i: (i, 0)),
                ],
                out_specs=pl.BlockSpec((block_rows, LANE), lambda i: (i, 0)),
            ),
            compiler_params=pltpu.CompilerParams(
                dimension_semantics=("parallel",)),
        )(x2, t2)
        return out.reshape(-1)[:n].reshape(logits.shape)

    total_blocks = pl.cdiv(rows_arr, block_rows)
    n_split = max(1, min(int(num_splits), total_blocks))
    bps = pl.cdiv(total_blocks, n_split)          # blocks per split
    block_elems = block_rows * LANE
    needs_mask = (n_split * bps * block_elems != n)
    n_full_blocks = n // block_elems
    max_block = total_blocks - 1

    if n_split * bps > total_blocks:
        # Grid over-covers the data: clamp the block index (extra blocks are
        # fully masked in-kernel) so the DMA never leaves the array.
        in_idx = lambda c, i: (jnp.minimum(c * bps + i, max_block), 0)
    else:
        in_idx = lambda c, i: (c * bps + i, 0)

    kernel = functools.partial(
        _focal_reduce_kernel, alpha=float(alpha), gamma=float(gamma),
        n_valid=n, block_rows=block_rows, blocks_per_split=bps,
        n_full_blocks=n_full_blocks, needs_mask=needs_mask)

    out = pl.pallas_call(
        kernel,
        out_shape=jax.ShapeDtypeStruct((n_split, SUBLANE, LANE), jnp.float32),
        grid_spec=pltpu.PrefetchScalarGridSpec(
            num_scalar_prefetch=0,
            grid=(n_split, bps),
            in_specs=[
                pl.BlockSpec((block_rows, LANE), in_idx),
                pl.BlockSpec((block_rows, LANE), in_idx),
            ],
            out_specs=pl.BlockSpec((1, SUBLANE, LANE), lambda c, i: (c, 0, 0)),
        ),
        compiler_params=pltpu.CompilerParams(
            dimension_semantics=("parallel", "arbitrary")),
    )(x2, t2)

    total = jnp.sum(out)            # single tiny cross-lane reduce, once
    if reduction == "mean":
        return total / jnp.float32(n)
    return total


def _reference(logits, targets, alpha=0.25, gamma=2.0, reduction="mean"):
    x = logits.astype(jnp.float32)
    t = targets.astype(jnp.float32)
    ce = jnp.maximum(x, 0.0) - x * t + jnp.log1p(jnp.exp(-jnp.abs(x)))
    p = jax.nn.sigmoid(x)
    p_t = p * t + (1.0 - p) * (1.0 - t)
    loss = ce * (1.0 - p_t) ** gamma
    if alpha >= 0:
        alpha_t = alpha * t + (1.0 - alpha) * (1.0 - t)
        loss = alpha_t * loss
    if reduction == "mean":
        return jnp.mean(loss)
    if reduction == "sum":
        return jnp.sum(loss)
    return loss


if __name__ == "__main__":
    key = jax.random.PRNGKey(0)
    k1, k2, k3, k4 = jax.random.split(key, 4)

    # Main check: NCHW-like [2, 4, 16, 16], mean reduction (module defaults).
    shape = (2, 4, 16, 16)
    logits = jax.random.normal(k1, shape, dtype=jnp.float32) * 2.0
    targets = (jax.random.uniform(k2, shape) > 0.5).astype(jnp.float32)

    loss = bf_with_logits_loss(logits, targets, alpha=0.25, gamma=2.0,
                               reduction="mean")
    loss = jax.block_until_ready(loss)
    ref = _reference(logits, targets)
    assert jnp.allclose(loss, ref, rtol=1e-4, atol=1e-6), (loss, ref)

    # Sum reduction on the same inputs.
    loss_s = jax.block_until_ready(
        bf_with_logits_loss(logits, targets, reduction="sum"))
    ref_s = _reference(logits, targets, reduction="sum")
    assert jnp.allclose(loss_s, ref_s, rtol=1e-4, atol=1e-5), (loss_s, ref_s)

    # Elementwise ('none') reduction.
    loss_n = jax.block_until_ready(
        bf_with_logits_loss(logits, targets, reduction="none"))
    ref_n = _reference(logits, targets, reduction="none")
    assert jnp.allclose(loss_n, ref_n, rtol=1e-4, atol=1e-6)

    # Non-lane-divisible shape exercises the pad + masked-tail path.
    shape2 = (2, 3, 7, 11)
    lg2 = jax.random.normal(k3, shape2, dtype=jnp.float32) * 2.0
    tg2 = (jax.random.uniform(k4, shape2) > 0.5).astype(jnp.float32)
    loss2 = jax.block_until_ready(bf_with_logits_loss(lg2, tg2))
    ref2 = _reference(lg2, tg2)
    assert jnp.allclose(loss2, ref2, rtol=1e-4, atol=1e-6), (loss2, ref2)

    # Small tile forces the 2-way split / multi-block / clamped-grid paths.
    shape3 = (2, 4, 64, 64)
    lg3 = jax.random.normal(k1, shape3, dtype=jnp.float32)
    tg3 = (jax.random.uniform(k2, shape3) > 0.5).astype(jnp.float32)
    loss3 = jax.block_until_ready(
        bf_with_logits_loss(lg3, tg3, block_rows=96, num_splits=2))
    ref3 = _reference(lg3, tg3)
    assert jnp.allclose(loss3, ref3, rtol=1e-4, atol=1e-6), (loss3, ref3)

    print("KERNEL_OK")
</pallas_src>

<mosaic_0001>
module attributes {stable_mosaic.version = 11 : i64} {
  func.func @_focal_reduce_kernel(%arg0: i32, %arg1: i32, %arg2: memref<16x128xf32, #tpu.memory_space<vmem>>, %arg3: memref<16x128xf32, #tpu.memory_space<vmem>>, %arg4: memref<1x8x128xf32, #tpu.memory_space<vmem>>) attributes {dimension_semantics = [#tpu.dimension_semantics<parallel>, #tpu.dimension_semantics<arbitrary>], iteration_bounds = array<i64: 1, 1>, scalar_prefetch = 0 : i64, scratch_operands = 0 : i64, tpu.core_type = #tpu.core_type<tc>, window_params = [{transform_indices = @transform_0, window_bounds = array<i64: 16, 128>}, {transform_indices = @transform_1, window_bounds = array<i64: 16, 128>}, {transform_indices = @transform_2, window_bounds = array<i64: 1, 8, 128>}]} {
    %c0_i32 = arith.constant 0 : i32
    %0 = arith.cmpi eq, %arg1, %c0_i32 : i32
    %1 = arith.extui %0 : i1 to i32
    %c0_i32_0 = arith.constant 0 : i32
    %2 = arith.cmpi ne, %1, %c0_i32_0 : i32
    scf.if %2 {
      %cst_21 = arith.constant 0.000000e+00 : f32
      %48 = vector.broadcast %cst_21 : f32 to vector<1x8x128xf32>
      %c0_22 = arith.constant 0 : index
      %c0_23 = arith.constant 0 : index
      %c0_24 = arith.constant 0 : index
      %49 = vector.load %arg4[%c0_22, %c0_23, %c0_24] : memref<1x8x128xf32, #tpu.memory_space<vmem>>, vector<1x8x128xf32>
      tpu.vector_store %arg4[%c0_22, %c0_23, %c0_24], %48 {strides = array<i32>} : memref<1x8x128xf32, #tpu.memory_space<vmem>>, vector<1x8x128xf32>,
    } else {
    }
    %c0 = arith.constant 0 : index
    %c0_1 = arith.constant 0 : index
    %3 = vector.load %arg2[%c0, %c0_1] : memref<16x128xf32, #tpu.memory_space<vmem>>, vector<16x128xf32>
    %c0_2 = arith.constant 0 : index
    %c0_3 = arith.constant 0 : index
    %4 = vector.load %arg3[%c0_2, %c0_3] : memref<16x128xf32, #tpu.memory_space<vmem>>, vector<16x128xf32>
    %5 = math.absf %3 : vector<16x128xf32>
    %cst = arith.constant 0.000000e+00 : f32
    %6 = vector.broadcast %cst : f32 to vector<16x128xf32>
    %7 = arith.subf %6, %5 : vector<16x128xf32>
    %8 = math.exp %7 : vector<16x128xf32>
    %cst_4 = arith.constant 0.000000e+00 : f32
    %9 = vector.broadcast %cst_4 : f32 to vector<16x128xf32>
    %10 = arith.maximumf %3, %9 : vector<16x128xf32>
    %11 = arith.mulf %3, %4 : vector<16x128xf32>
    %12 = arith.subf %10, %11 : vector<16x128xf32>
    %13 = math.log1p %8 : vector<16x128xf32>
    %14 = arith.addf %12, %13 : vector<16x128xf32>
    %cst_5 = arith.constant 1.000000e+00 : f32
    %15 = vector.broadcast %cst_5 : f32 to vector<16x128xf32>
    %16 = arith.addf %15, %8 : vector<16x128xf32>
    %cst_6 = arith.constant 1.000000e+00 : f32
    %17 = vector.broadcast %cst_6 : f32 to vector<16x128xf32>
    %18 = arith.divf %17, %16 : vector<16x128xf32>
    %cst_7 = arith.constant 0.000000e+00 : f32
    %19 = vector.broadcast %cst_7 : f32 to vector<16x128xf32>
    %20 = arith.cmpf oge, %3, %19 : vector<16x128xf32>
    %21 = arith.mulf %8, %18 : vector<16x128xf32>
    %22 = arith.select %20, %18, %21 : vector<16x128xi1>, vector<16x128xf32>
    %23 = arith.mulf %22, %4 : vector<16x128xf32>
    %cst_8 = arith.constant 1.000000e+00 : f32
    %24 = vector.broadcast %cst_8 : f32 to vector<16x128xf32>
    %25 = arith.subf %24, %22 : vector<16x128xf32>
    %cst_9 = arith.constant 1.000000e+00 : f32
    %26 = vector.broadcast %cst_9 : f32 to vector<16x128xf32>
    %27 = arith.subf %26, %4 : vector<16x128xf32>
    %28 = arith.mulf %25, %27 : vector<16x128xf32>
    %29 = arith.addf %23, %28 : vector<16x128xf32>
    %cst_10 = arith.constant 1.000000e+00 : f32
    %30 = vector.broadcast %cst_10 : f32 to vector<16x128xf32>
    %31 = arith.subf %30, %29 : vector<16x128xf32>
    %32 = arith.mulf %31, %31 : vector<16x128xf32>
    %33 = arith.mulf %14, %32 : vector<16x128xf32>
    %cst_11 = arith.constant 2.500000e-01 : f32
    %34 = vector.broadcast %cst_11 : f32 to vector<16x128xf32>
    %35 = arith.mulf %34, %4 : vector<16x128xf32>
    %cst_12 = arith.constant 1.000000e+00 : f32
    %36 = vector.broadcast %cst_12 : f32 to vector<16x128xf32>
    %37 = arith.subf %36, %4 : vector<16x128xf32>
    %cst_13 = arith.constant 7.500000e-01 : f32
    %38 = vector.broadcast %cst_13 : f32 to vector<16x128xf32>
    %39 = arith.mulf %38, %37 : vector<16x128xf32>
    %40 = arith.addf %35, %39 : vector<16x128xf32>
    %41 = arith.mulf %40, %33 : vector<16x128xf32>
    %c0_14 = arith.constant 0 : index
    %c0_15 = arith.constant 0 : index
    %c0_16 = arith.constant 0 : index
    %42 = vector.load %arg4[%c0_14, %c0_15, %c0_16] : memref<1x8x128xf32, #tpu.memory_space<vmem>>, vector<1x8x128xf32>
    %43 = vector.shape_cast %41 : vector<16x128xf32> to vector<2x8x128xf32>
    %cst_17 = arith.constant dense<0.000000e+00> : vector<8x128xf32>
    %44 = vector.multi_reduction <add>, %43, %cst_17 [0] : vector<2x8x128xf32> to vector<8x128xf32>
    %45 = vector.shape_cast %44 : vector<8x128xf32> to vector<1x8x128xf32>
    %46 = arith.addf %42, %45 : vector<1x8x128xf32>
    %c0_18 = arith.constant 0 : index
    %c0_19 = arith.constant 0 : index
    %c0_20 = arith.constant 0 : index
    %47 = vector.load %arg4[%c0_18, %c0_19, %c0_20] : memref<1x8x128xf32, #tpu.memory_space<vmem>>, vector<1x8x128xf32>
    tpu.vector_store %arg4[%c0_18, %c0_19, %c0_20], %46 {strides = array<i32>} : memref<1x8x128xf32, #tpu.memory_space<vmem>>, vector<1x8x128xf32>,
    return
  }
  func.func @transform_0(%arg0: i32, %arg1: i32) -> (i32, i32) {
    %c1_i32 = arith.constant 1 : i32
    %0 = arith.muli %arg0, %c1_i32 : i32
    %1 = arith.addi %0, %arg1 : i32
    %c0_i32 = arith.constant 0 : i32
    %c0_i32_0 = arith.constant 0 : i32
    return %1, %c0_i32 : i32, i32
  }
  func.func @transform_1(%arg0: i32, %arg1: i32) -> (i32, i32) {
    %c1_i32 = arith.constant 1 : i32
    %0 = arith.muli %arg0, %c1_i32 : i32
    %1 = arith.addi %0, %arg1 : i32
    %c0_i32 = arith.constant 0 : i32
    %c0_i32_0 = arith.constant 0 : i32
    return %1, %c0_i32 : i32, i32
  }
  func.func @transform_2(%arg0: i32, %arg1: i32) -> (i32, i32, i32) {
    %c0_i32 = arith.constant 0 : i32
    %c0_i32_0 = arith.constant 0 : i32
    %c0_i32_1 = arith.constant 0 : i32
    return %arg0, %c0_i32, %c0_i32_0 : i32, i32, i32
  }
}

</mosaic_0001>

<bundles_post_ra>
// kernel: tpu_custom_call.1
= control target key start
LH: loop header
LB: loop body
LE: loop exit
PB: predicated region body
PF: predicated region fallthrough
CT: control target
= control target key end

     0   :  { %7 = vsyncpa [#allocation3], 0  ;;  %s309_s0 = inlined_call_operand.hbm [shape: f32[16,128], index: 0, kind: input, shape index: {}]   ;;  %s310_s1 = inlined_call_operand.hbm [shape: f32[16,128], index: 1, kind: input, shape index: {}]   ;;  %s311_s2 = inlined_call_operand.hbm [shape: f32[1,8,128], index: 2, kind: output, shape index: {}]  }
   0x1   :  { %8 = vsyncpa [#allocation6], 0 }
   0x2   :  { %9 = vsyncpa [#allocation4], 0  ;;  %s241_s9 = smov [#allocation2]   ;;  %s169_s13 = scalar_lea.hbm %s309_s0, 256 }
   0x3   :  { %s19_s10 = sshll.u32 %s241_s9, 4  ;;  %p170_p0 = scmp.ne.s32.totalorder %s309_s0, %s169_s13  ;;  %s20_s10 = int_to_ptr.vmem [resolvable:$true] %s19_s10 }
   0x4   :  { %p173_p1 = scmp.lt.u32.totalorder %s169_s13, %s309_s0 }
   0x6   :  { %p175_p2 = pnand %p173_p1, %p170_p0 }
   0x8   :  { %178 = shalt.err (!%p175_p2)
}
   0x9   :  { %s179_s18 = scalar_lea.vmem %s20_s10, 256  ;;  %p184_p4 = scmp.lt.s32.totalorder %s20_s10, %s20_s10 }
   0xa   :  { %p180_p3 = scmp.ne.s32.totalorder %s20_s10, %s179_s18  ;;  %p185_p5 = scmp.lt.s32.totalorder %s179_s18, %s179_s18 }
   0xc   :  { %p186_p6 = por %p185_p5, %p184_p4 }
   0xe   :  { %p187_p7 = pnand %p186_p6, %p180_p3 }
  0x10   :  { %190 = shalt.err (!%p187_p7)
}
  0x11   :  { %s242_s19 = smov 128   ;;  %s243_s20 = smov 8  }
  0x12   :  { %25 = dma.hbm_to_vmem [thread:$0]  %s309_s0, 256, %s20_s10, [#allocation3], %s242_s19, %s242_s19, %s243_s20  }
  0x13   :  { %s244_s23 = smov [#allocation5]   ;;  %s191_s27 = scalar_lea.hbm %s310_s1, 256 }
  0x14   :  { %s35_s24 = sshll.u32 %s244_s23, 4  ;;  %p192_p8 = scmp.ne.s32.totalorder %s310_s1, %s191_s27  ;;  %s36_s24 = int_to_ptr.vmem [resolvable:$true] %s35_s24 }
  0x15   :  { %p195_p9 = scmp.lt.u32.totalorder %s191_s27, %s310_s1 }
  0x17   :  { %p197_p10 = pnand %p195_p9, %p192_p8 }
  0x19   :  { %200 = shalt.err (!%p197_p10)
}
  0x1a   :  { %s201_s4 = scalar_lea.vmem %s36_s24, 256  ;;  %p206_p12 = scmp.lt.s32.totalorder %s36_s24, %s36_s24 }
  0x1b   :  { %p202_p11 = scmp.ne.s32.totalorder %s36_s24, %s201_s4  ;;  %p207_p13 = scmp.lt.s32.totalorder %s201_s4, %s201_s4 }
  0x1d   :  { %p208_p0 = por %p207_p13, %p206_p12 }
  0x1f   :  { %p209_p1 = pnand %p208_p0, %p202_p11 }
  0x21   :  { %212 = shalt.err (!%p209_p1)
}
  0x22   :  { %41 = dma.hbm_to_vmem [thread:$0]  %s310_s1, 256, %s36_s24, [#allocation6], %s242_s19, %s242_s19, %s243_s20  }
  0x23   :  { %235 = dma.done.wait [#allocation3], 256  }
  0x24   :  { %236 = vsyncadd [#allocation3], 4294967040 }
  0x25   :  { %237 = dma.done.wait [#allocation6], 256  }
  0x26   :  { %238 = vsyncadd [#allocation6], 4294967040  ;;  %v57_v0 = vld [vmem:[#allocation2] sm:$0xff]  ;;  %v58_v1 = vld [vmem:[#allocation2 + $0x8] sm:$0xff]  ;;  %s245_s1 = smov [#allocation7]  }
  0x27   :  { %v61_v2 = vand.u32 2147483647, %v57_v0  ;;  %v62_v3 = vand.u32 2147483647, %v58_v1  ;;  %v59_v17 = vld [vmem:[#allocation5] sm:$0xff]  ;;  %v60_v18 = vld [vmem:[#allocation5 + $0x8] sm:$0xff] }
  0x28   :  { %v69_v22 = vmax.f32 %v57_v0, 0.0  ;;  %v70_v23 = vmax.f32 %v58_v1, 0.0  ;;  %v71_v24 = vmul.f32 %v59_v17, %v57_v0  ;;  %vm101_vm0 = vcmp.ge.f32.partialorder %v57_v0, 0.0  ;;  %s141_s6 = sshll.u32 %s245_s1, 4  ;;  %s142_s6 = int_to_ptr.vmem [resolvable:$true] %s141_s6 }
  0x29   :  { %v63_v4 = vsub.f32 0.0, %v61_v2  ;;  %v64_v5 = vsub.f32 0.0, %v62_v3  ;;  %v72_v26 = vmul.f32 %v60_v18, %v58_v1  ;;  %vm102_vm1 = vcmp.ge.f32.partialorder %v58_v1, 0.0  ;;  %s213_s7 = scalar_lea.vmem %s142_s6, 128  ;;  %p218_p3 = scmp.lt.s32.totalorder %s142_s6, %s142_s6 }
  0x2a   :  { %v111_v31 = vsub.f32 1.0, %v59_v17  ;;  %v112_v32 = vsub.f32 1.0, %v60_v18  ;;  %v73_v44 = vsub.f32 %v69_v22, %v71_v24  ;;  %v123_v51 = vmul.f32 0.25, %v59_v17  ;;  %p214_p2 = scmp.ne.s32.totalorder %s142_s6, %s213_s7  ;;  %p219_p4 = scmp.lt.s32.totalorder %s213_s7, %s213_s7 }
  0x2b   :  { %v65_v6 = vmul.f32 1.442695, %v63_v4  ;;  %v67_v7 = vmul.f32 1.442695, %v64_v5  ;;  %v74_v46 = vsub.f32 %v70_v23, %v72_v26  ;;  %v124_v54 = vmul.f32 0.25, %v60_v18 }
  0x2c   :  { %v125_v52 = vmul.f32 0.75, %v111_v31  ;;  %v126_v55 = vmul.f32 0.75, %v112_v32  ;;  %p220_p5 = por %p219_p4, %p218_p3 }
  0x2d   :  { %157 = vpow2.f32 %v65_v6 }
  0x2e   :  { %159 = vpow2.f32 %v67_v7  ;;  %v127_v61 = vadd.f32 %v125_v52, %v123_v51  ;;  %v128_v63 = vadd.f32 %v126_v55, %v124_v54  ;;  %p221_p6 = pnand %p220_p5, %p214_p2 }
  0x37   :  { %v158_v8 = vpop.eup %157 }
  0x38   :  { %v160_v9 = vpop.eup %159  ;;  %v75_v10 = vadd.f32 1.0, %v158_v8  ;;  %v78_v12 = vmul.f32 -0.5, %v158_v8  ;;  %v81_v15 = vand.u32 2147483647, %v158_v8 }
  0x39   :  { %v84_v11 = vadd.f32 1.0, %v160_v9  ;;  %v87_v13 = vmul.f32 -0.5, %v160_v9  ;;  %v90_v27 = vand.u32 2147483647, %v160_v9 }
  0x3a   :  { %161 = vlog2.f32 %v75_v10  ;;  %v79_v19 = vadd.f32 1.0, %v78_v12  ;;  %vm285_vm2 = vcmp.lt.f32.partialorder %v81_v15, 0.0004427343 }
  0x3b   :  { %163 = vlog2.f32 %v84_v11  ;;  %v88_v20 = vadd.f32 1.0, %v87_v13  ;;  %vm289_vm3 = vcmp.lt.f32.partialorder %v90_v27, 0.0004427343 }
  0x3c   :  { %165 = vrcp.f32 %v75_v10  ;;  %v80_v34 = vmul.f32 %v158_v8, %v79_v19 }
  0x3d   :  { %167 = vrcp.f32 %v84_v11  ;;  %v89_v35 = vmul.f32 %v160_v9, %v88_v20 }
  0x44   :  { %v162_v14 = vpop.eup %161 }
  0x45   :  { %v164_v16 = vpop.eup %163  ;;  %v77_v33 = vmul.f32 0.6931472, %v162_v14 }
  0x46   :  { %v166_v21 = vpop.eup %165  ;;  %v86_v37 = vmul.f32 0.6931472, %v164_v16 }
  0x47   :  { %v168_v25 = vpop.eup %167  ;;  %v103_v28 = vmul.f32 %v166_v21, %v158_v8  ;;  %v83_v47 = vsel %vm285_vm2, %v80_v34, %v77_v33 }
  0x48   :  { %v104_v30 = vmul.f32 %v168_v25, %v160_v9  ;;  %v92_v49 = vsel %vm289_vm3, %v89_v35, %v86_v37  ;;  %v93_v56 = vadd.f32 %v83_v47, %v73_v44 }
  0x49   :  { %v105_v36 = vsel %vm101_vm0, %v166_v21, %v103_v28  ;;  %v94_v58 = vadd.f32 %v92_v49, %v74_v46 }
  0x4a   :  { %v106_v38 = vsel %vm102_vm1, %v168_v25, %v104_v30  ;;  %v107_v39 = vmul.f32 %v105_v36, %v59_v17  ;;  %v109_v40 = vsub.f32 1.0, %v105_v36 }
  0x4b   :  { %v108_v42 = vmul.f32 %v106_v38, %v60_v18  ;;  %v110_v43 = vsub.f32 1.0, %v106_v38 }
  0x4c   :  { %v113_v45 = vmul.f32 %v111_v31, %v109_v40 }
  0x4d   :  { %v114_v48 = vmul.f32 %v112_v32, %v110_v43 }
  0x4e   :  { %v115_v50 = vadd.f32 %v113_v45, %v107_v39 }
  0x4f   :  { %v116_v53 = vadd.f32 %v114_v48, %v108_v42 }
  0x50   :  { %v117_v57 = vsub.f32 1.0, %v115_v50 }
  0x51   :  { %v118_v59 = vsub.f32 1.0, %v116_v53 }
  0x52   :  { %v119_v60 = vmul.f32 %v117_v57, %v117_v57 }
  0x53   :  { %v120_v62 = vmul.f32 %v118_v59, %v118_v59 }
  0x54   :  { %v121_v0 = vmul.f32 %v119_v60, %v93_v56 }
  0x55   :  { %v122_v1 = vmul.f32 %v120_v62, %v94_v58 }
  0x56   :  { %v129_v2 = vmul.f32 %v127_v61, %v121_v0 }
  0x57   :  { %v130_v3 = vmul.f32 %v128_v63, %v122_v1 }
  0x59   :  { %v132_v4 = vadd.f32 %v130_v3, %v129_v2 }
  0x5b   :  { %134 = vst [vmem:[#allocation7] sm:$0xff] %v132_v4 }
  0x5c   :  { %224 = shalt.err (!%p221_p6)
}
  0x5d   :  { %s225_s10 = scalar_lea.hbm %s311_s2, 128 }
  0x5e   :  { %p226_p7 = scmp.ne.s32.totalorder %s311_s2, %s225_s10  ;;  %p229_p8 = scmp.lt.u32.totalorder %s225_s10, %s311_s2 }
  0x60   :  { %p231_p9 = pnand %p229_p8, %p226_p7 }
  0x62   :  { %234 = shalt.err (!%p231_p9)
}
  0x63   :  { %144 = dma.vmem_to_hbm [thread:$0]  %s142_s6, 128, %s311_s2, [#allocation4]  }
  0x64   :  { %239 = dma.done.wait [#allocation4], 128  }
  0x65   :  { %240 = vsyncadd [#allocation4], 4294967168 }
  0x66   :  { %148 = vsyncpa [#allocation3], 1 }
  0x67   :  { %149 = vsyncpa [#allocation6], 1 }
  0x68   :  { %150 = vsyncpa [#allocation4], 1 }

</bundles_post_ra>
